<compile_context>
chip_gen: v7x
topology: tpu7x:2x2x1
jax: 0.10.0
libtpu: 0.0.40
codegen_flags: <defaults>
</compile_context>

<pallas_src>
import jax
import jax.numpy as jnp
import numpy as np
from jax.experimental import pallas as pl
from jax.experimental.pallas import tpu as pltpu


def lstm_tagger_kernel(ids_ref,        # VMEM (T, 1)      int32 token ids
                       emb_proj_ref,   # VMEM (V_pad, 4H) embedding pre-projected
                                       #                  into gate space (+ bias),
                                       #                  gate order (i, f, o, g)
                       whh_ref,        # VMEM (H, 4H)     W_hh^T, gate order (i, f, o, g)
                       wout_ref,       # VMEM (H, C)      hidden2tag weight^T
                       bout_ref,       # VMEM (1, C)      hidden2tag bias
                       out_ref):       # VMEM (T, C)      tag_space output
    T = ids_ref.shape[0]
    V_pad = emb_proj_ref.shape[0]
    H = whh_ref.shape[0]

    # 1) Embedding gather + input projection in ONE MXU matmul:
    #    one_hot(T, V_pad) @ emb_proj(V_pad, 4H) = gates_x(T, 4H),
    #    where emb_proj rows already include b_ih + b_hh.
    vocab_iota = jax.lax.broadcasted_iota(jnp.int32, (T, V_pad), 1)
    one_hot = (vocab_iota == ids_ref[...]).astype(jnp.float32)       # (T, V_pad)
    gates_x = jnp.dot(one_hot, emb_proj_ref[...],
                      preferred_element_type=jnp.float32)            # (T, 4H)

    # 2) Recurrence, fully unrolled (T static, tiny); h, c and all hidden
    #    states live in vregs — no VMEM round-trips on the serial chain.
    h = jnp.zeros((1, H), jnp.float32)
    c = jnp.zeros((1, H), jnp.float32)
    hs = []
    for t in range(T):
        gates = gates_x[t:t + 1, :] + jnp.dot(
            h, whh_ref[...], preferred_element_type=jnp.float32)     # (1, 4H)
        sig = jax.nn.sigmoid(gates[:, :3 * H])    # fused i, f, o gates (1 EUP pass)
        g_g = jnp.tanh(gates[:, 3 * H:])          # cell candidate
        i_g = sig[:, 0 * H:1 * H]
        f_g = sig[:, 1 * H:2 * H]
        o_g = sig[:, 2 * H:3 * H]
        c = f_g * c + i_g * g_g
        h = o_g * jnp.tanh(c)
        hs.append(h)

    hs_all = jnp.concatenate(hs, axis=0)          # (T, H), stays in vregs

    # 3) hidden2tag: (T, H) @ (H, C) + bias.
    out_ref[...] = (jnp.dot(hs_all, wout_ref[...],
                            preferred_element_type=jnp.float32)
                    + bout_ref[...]).astype(out_ref.dtype)


def prepare_kernel_params(params):
    """One-time weight prep (run once, cache the result).

    - gate permutation (i,f,g,o) -> (i,f,o,g) so sigmoid gates are contiguous,
    - transpose W_ih / W_hh / W_out for right-multiplication,
    - fold embedding table through the input projection + fused bias:
        emb_proj[v] = embedding[v] @ W_ih^T + (b_ih + b_hh)
    - zero-pad the vocab axis to a lane-friendly multiple of 128 (OOB / padded
      ids then gather deterministic zero rows).
    """
    H = params["w_hh"].shape[1]
    C = params["w_out"].shape[0]
    V = params["embedding"].shape[0]

    def permute_gates(w):  # torch rows [i | f | g | o] -> [i | f | o | g]
        return jnp.concatenate(
            [w[0 * H:1 * H], w[1 * H:2 * H], w[3 * H:4 * H], w[2 * H:3 * H]],
            axis=0)

    wih_t = jnp.transpose(permute_gates(params["w_ih"]))            # (E, 4H)
    bias = permute_gates(params["b_ih"] + params["b_hh"]).reshape(1, 4 * H)

    emb_proj = params["embedding"] @ wih_t + bias                   # (V, 4H)
    v_pad = max(128, ((V + 127) // 128) * 128)
    emb_proj = jnp.pad(emb_proj, ((0, v_pad - V), (0, 0)))          # (V_pad, 4H)

    return {
        "emb_proj": emb_proj.astype(jnp.float32),                   # (V_pad, 4H)
        "whh_t": jnp.transpose(permute_gates(params["w_hh"])),      # (H, 4H)
        "wout_t": jnp.transpose(params["w_out"]),                   # (H, C)
        "bout": params["b_out"].reshape(1, C),                      # (1, C)
    }


@jax.jit
def lstm_tagger_forward(sentence, prepared):
    """Whole forward pass (gather + LSTM + linear) in one pallas_call."""
    emb_proj = prepared["emb_proj"]
    whh_t = prepared["whh_t"]
    wout_t = prepared["wout_t"]
    bout = prepared["bout"]

    T = sentence.shape[0]
    V_pad, G = emb_proj.shape
    H = whh_t.shape[0]
    C = wout_t.shape[1]

    ids = sentence.astype(jnp.int32).reshape(T, 1)

    grid_spec = pltpu.PrefetchScalarGridSpec(
        num_scalar_prefetch=0,
        grid=(1,),
        in_specs=[
            pl.BlockSpec((T, 1), lambda i: (0, 0)),        # token ids
            pl.BlockSpec((V_pad, G), lambda i: (0, 0)),    # pre-projected table
            pl.BlockSpec((H, G), lambda i: (0, 0)),        # W_hh^T (permuted)
            pl.BlockSpec((H, C), lambda i: (0, 0)),        # W_out^T
            pl.BlockSpec((1, C), lambda i: (0, 0)),        # b_out
        ],
        out_specs=pl.BlockSpec((T, C), lambda i: (0, 0)),
    )
    return pl.pallas_call(
        lstm_tagger_kernel,
        out_shape=jax.ShapeDtypeStruct((T, C), jnp.float32),
        grid_spec=grid_spec,
        compiler_params=pltpu.CompilerParams(
            dimension_semantics=("arbitrary",)),
    )(ids, emb_proj, whh_t, wout_t, bout)


def lstm_tagger_reference(sentence, params):
    """Pure-JAX reference mirroring torch.nn.LSTM semantics (gate order i,f,g,o)."""
    H = params["w_hh"].shape[1]
    emb = params["embedding"][sentence]                       # (T, E)
    w_ih, w_hh = params["w_ih"], params["w_hh"]
    bias = params["b_ih"] + params["b_hh"]

    def step(carry, x_t):
        h, c = carry
        gates = x_t @ w_ih.T + h @ w_hh.T + bias
        i = jax.nn.sigmoid(gates[0 * H:1 * H])
        f = jax.nn.sigmoid(gates[1 * H:2 * H])
        g = jnp.tanh(gates[2 * H:3 * H])
        o = jax.nn.sigmoid(gates[3 * H:4 * H])
        c = f * c + i * g
        h = o * jnp.tanh(c)
        return (h, c), h

    init = (jnp.zeros((H,), jnp.float32), jnp.zeros((H,), jnp.float32))
    _, hs = jax.lax.scan(step, init, emb)
    return hs @ params["w_out"].T + params["b_out"]


def init_params(key, vocab_size, embedding_dim, hidden_dim, tagset_size):
    """Deterministic, PyTorch-like initialization (uniform +-1/sqrt(H))."""
    ks = jax.random.split(key, 7)
    stdv = 1.0 / jnp.sqrt(hidden_dim)
    return {
        "embedding": jax.random.normal(ks[0], (vocab_size, embedding_dim),
                                       jnp.float32),
        "w_ih": jax.random.uniform(ks[1], (4 * hidden_dim, embedding_dim),
                                   jnp.float32, -stdv, stdv),
        "w_hh": jax.random.uniform(ks[2], (4 * hidden_dim, hidden_dim),
                                   jnp.float32, -stdv, stdv),
        "b_ih": jax.random.uniform(ks[3], (4 * hidden_dim,),
                                   jnp.float32, -stdv, stdv),
        "b_hh": jax.random.uniform(ks[4], (4 * hidden_dim,),
                                   jnp.float32, -stdv, stdv),
        "w_out": jax.random.uniform(ks[5], (tagset_size, hidden_dim),
                                    jnp.float32, -stdv, stdv),
        "b_out": jax.random.uniform(ks[6], (tagset_size,),
                                    jnp.float32, -stdv, stdv),
    }


if __name__ == "__main__":
    # The source script's vocab_size is 0 (empty word_to_id), which is
    # degenerate; use a small synthetic vocab instead.
    VOCAB = 20
    EMBED_DIM = 32
    HIDDEN_DIM = 32
    TAGSET = 3          # {'DET', 'NN', 'V'}
    SEQ_LEN = 8

    key = jax.random.PRNGKey(0)
    pkey, skey = jax.random.split(key)
    params = init_params(pkey, VOCAB, EMBED_DIM, HIDDEN_DIM, TAGSET)
    prepared = prepare_kernel_params(params)      # one-time weight prep (cached)
    sentence = jax.random.randint(skey, (SEQ_LEN,), 0, VOCAB, dtype=jnp.int32)

    tag_space = jax.block_until_ready(lstm_tagger_forward(sentence, prepared))
    assert tag_space.shape == (SEQ_LEN, TAGSET)
    assert tag_space.dtype == jnp.float32

    ref = jax.block_until_ready(lstm_tagger_reference(sentence, params))
    np.testing.assert_allclose(np.asarray(tag_space), np.asarray(ref),
                               rtol=1e-4, atol=1e-4)
    print("KERNEL_OK")
</pallas_src>

<mosaic_0001>
module attributes {stable_mosaic.version = 11 : i64} {
  func.func @lstm_tagger_kernel(%arg0: i32, %arg1: memref<8x1xi32, #tpu.memory_space<vmem>>, %arg2: memref<128x128xf32, #tpu.memory_space<vmem>>, %arg3: memref<32x128xf32, #tpu.memory_space<vmem>>, %arg4: memref<32x3xf32, #tpu.memory_space<vmem>>, %arg5: memref<1x3xf32, #tpu.memory_space<vmem>>, %arg6: memref<8x3xf32, #tpu.memory_space<vmem>>) attributes {dimension_semantics = [#tpu.dimension_semantics<arbitrary>], iteration_bounds = array<i64: 1>, scalar_prefetch = 0 : i64, scratch_operands = 0 : i64, tpu.core_type = #tpu.core_type<tc>, window_params = [{pipeline_mode = #tpu.pipeline_mode<synchronous>, transform_indices = @transform_0, window_bounds = array<i64: 8, 1>}, {pipeline_mode = #tpu.pipeline_mode<synchronous>, transform_indices = @transform_1, window_bounds = array<i64: 128, 128>}, {pipeline_mode = #tpu.pipeline_mode<synchronous>, transform_indices = @transform_2, window_bounds = array<i64: 32, 128>}, {pipeline_mode = #tpu.pipeline_mode<synchronous>, transform_indices = @transform_3, window_bounds = array<i64: 32, 3>}, {pipeline_mode = #tpu.pipeline_mode<synchronous>, transform_indices = @transform_4, window_bounds = array<i64: 1, 3>}, {pipeline_mode = #tpu.pipeline_mode<synchronous>, transform_indices = @transform_5, window_bounds = array<i64: 8, 3>}]} {
    %0 = tpu.iota {dimensions = array<i32: 1>} : vector<8x128xi32>
    %c0 = arith.constant 0 : index
    %c0_0 = arith.constant 0 : index
    %1 = vector.load %arg1[%c0, %c0_0] : memref<8x1xi32, #tpu.memory_space<vmem>>, vector<8x1xi32>
    %2 = vector.broadcast %1 : vector<8x1xi32> to vector<8x128xi32>
    %3 = arith.cmpi eq, %0, %2 : vector<8x128xi32>
    %4 = arith.extui %3 : vector<8x128xi1> to vector<8x128xi32>
    %5 = arith.sitofp %4 : vector<8x128xi32> to vector<8x128xf32>
    %c0_1 = arith.constant 0 : index
    %c0_2 = arith.constant 0 : index
    %6 = vector.load %arg2[%c0_1, %c0_2] : memref<128x128xf32, #tpu.memory_space<vmem>>, vector<128x128xf32>
    %cst = arith.constant dense<0.000000e+00> : vector<8x128xf32>
    %7 = tpu.matmul %5, %6, %cst {dimension_numbers = #tpu.dot_dimension_numbers<[1], [0], [0], [1], [0, 0, 1, 1], [], []>} : vector<8x128xf32>, vector<128x128xf32>, vector<8x128xf32> -> vector<8x128xf32>
    %cst_3 = arith.constant 0.000000e+00 : f32
    %8 = vector.broadcast %cst_3 : f32 to vector<1x32xf32>
    %cst_4 = arith.constant 0.000000e+00 : f32
    %9 = vector.broadcast %cst_4 : f32 to vector<1x32xf32>
    %10 = vector.extract_strided_slice %7 {offsets = [0, 0], sizes = [1, 128], strides = [1, 1]} : vector<8x128xf32> to vector<1x128xf32>
    %c0_5 = arith.constant 0 : index
    %c0_6 = arith.constant 0 : index
    %11 = vector.load %arg3[%c0_5, %c0_6] : memref<32x128xf32, #tpu.memory_space<vmem>>, vector<32x128xf32>
    %cst_7 = arith.constant dense<0.000000e+00> : vector<1x128xf32>
    %12 = tpu.matmul %8, %11, %cst_7 {dimension_numbers = #tpu.dot_dimension_numbers<[1], [0], [0], [1], [0, 0, 1, 1], [], []>} : vector<1x32xf32>, vector<32x128xf32>, vector<1x128xf32> -> vector<1x128xf32>
    %13 = arith.addf %10, %12 : vector<1x128xf32>
    %14 = vector.extract_strided_slice %13 {offsets = [0, 0], sizes = [1, 96], strides = [1, 1]} : vector<1x128xf32> to vector<1x96xf32>
    %15 = arith.negf %14 : vector<1x96xf32>
    %16 = math.exp %15 : vector<1x96xf32>
    %cst_8 = arith.constant 1.000000e+00 : f32
    %17 = vector.broadcast %cst_8 : f32 to vector<1x96xf32>
    %18 = arith.addf %17, %16 : vector<1x96xf32>
    %19 = arith.divf %17, %18 : vector<1x96xf32>
    %20 = vector.extract_strided_slice %13 {offsets = [0, 96], sizes = [1, 32], strides = [1, 1]} : vector<1x128xf32> to vector<1x32xf32>
    %21 = math.tanh %20 : vector<1x32xf32>
    %22 = vector.extract_strided_slice %19 {offsets = [0, 0], sizes = [1, 32], strides = [1, 1]} : vector<1x96xf32> to vector<1x32xf32>
    %23 = vector.extract_strided_slice %19 {offsets = [0, 32], sizes = [1, 32], strides = [1, 1]} : vector<1x96xf32> to vector<1x32xf32>
    %24 = vector.extract_strided_slice %19 {offsets = [0, 64], sizes = [1, 32], strides = [1, 1]} : vector<1x96xf32> to vector<1x32xf32>
    %25 = arith.mulf %23, %9 : vector<1x32xf32>
    %26 = arith.mulf %22, %21 : vector<1x32xf32>
    %27 = arith.addf %25, %26 : vector<1x32xf32>
    %28 = math.tanh %27 : vector<1x32xf32>
    %29 = arith.mulf %24, %28 : vector<1x32xf32>
    %30 = vector.extract_strided_slice %7 {offsets = [1, 0], sizes = [1, 128], strides = [1, 1]} : vector<8x128xf32> to vector<1x128xf32>
    %c0_9 = arith.constant 0 : index
    %c0_10 = arith.constant 0 : index
    %31 = vector.load %arg3[%c0_9, %c0_10] : memref<32x128xf32, #tpu.memory_space<vmem>>, vector<32x128xf32>
    %cst_11 = arith.constant dense<0.000000e+00> : vector<1x128xf32>
    %32 = tpu.matmul %29, %31, %cst_11 {dimension_numbers = #tpu.dot_dimension_numbers<[1], [0], [0], [1], [0, 0, 1, 1], [], []>} : vector<1x32xf32>, vector<32x128xf32>, vector<1x128xf32> -> vector<1x128xf32>
    %33 = arith.addf %30, %32 : vector<1x128xf32>
    %34 = vector.extract_strided_slice %33 {offsets = [0, 0], sizes = [1, 96], strides = [1, 1]} : vector<1x128xf32> to vector<1x96xf32>
    %35 = arith.negf %34 : vector<1x96xf32>
    %36 = math.exp %35 : vector<1x96xf32>
    %cst_12 = arith.constant 1.000000e+00 : f32
    %37 = vector.broadcast %cst_12 : f32 to vector<1x96xf32>
    %38 = arith.addf %37, %36 : vector<1x96xf32>
    %39 = arith.divf %37, %38 : vector<1x96xf32>
    %40 = vector.extract_strided_slice %33 {offsets = [0, 96], sizes = [1, 32], strides = [1, 1]} : vector<1x128xf32> to vector<1x32xf32>
    %41 = math.tanh %40 : vector<1x32xf32>
    %42 = vector.extract_strided_slice %39 {offsets = [0, 0], sizes = [1, 32], strides = [1, 1]} : vector<1x96xf32> to vector<1x32xf32>
    %43 = vector.extract_strided_slice %39 {offsets = [0, 32], sizes = [1, 32], strides = [1, 1]} : vector<1x96xf32> to vector<1x32xf32>
    %44 = vector.extract_strided_slice %39 {offsets = [0, 64], sizes = [1, 32], strides = [1, 1]} : vector<1x96xf32> to vector<1x32xf32>
    %45 = arith.mulf %43, %27 : vector<1x32xf32>
    %46 = arith.mulf %42, %41 : vector<1x32xf32>
    %47 = arith.addf %45, %46 : vector<1x32xf32>
    %48 = math.tanh %47 : vector<1x32xf32>
    %49 = arith.mulf %44, %48 : vector<1x32xf32>
    %50 = vector.extract_strided_slice %7 {offsets = [2, 0], sizes = [1, 128], strides = [1, 1]} : vector<8x128xf32> to vector<1x128xf32>
    %c0_13 = arith.constant 0 : index
    %c0_14 = arith.constant 0 : index
    %51 = vector.load %arg3[%c0_13, %c0_14] : memref<32x128xf32, #tpu.memory_space<vmem>>, vector<32x128xf32>
    %cst_15 = arith.constant dense<0.000000e+00> : vector<1x128xf32>
    %52 = tpu.matmul %49, %51, %cst_15 {dimension_numbers = #tpu.dot_dimension_numbers<[1], [0], [0], [1], [0, 0, 1, 1], [], []>} : vector<1x32xf32>, vector<32x128xf32>, vector<1x128xf32> -> vector<1x128xf32>
    %53 = arith.addf %50, %52 : vector<1x128xf32>
    %54 = vector.extract_strided_slice %53 {offsets = [0, 0], sizes = [1, 96], strides = [1, 1]} : vector<1x128xf32> to vector<1x96xf32>
    %55 = arith.negf %54 : vector<1x96xf32>
    %56 = math.exp %55 : vector<1x96xf32>
    %cst_16 = arith.constant 1.000000e+00 : f32
    %57 = vector.broadcast %cst_16 : f32 to vector<1x96xf32>
    %58 = arith.addf %57, %56 : vector<1x96xf32>
    %59 = arith.divf %57, %58 : vector<1x96xf32>
    %60 = vector.extract_strided_slice %53 {offsets = [0, 96], sizes = [1, 32], strides = [1, 1]} : vector<1x128xf32> to vector<1x32xf32>
    %61 = math.tanh %60 : vector<1x32xf32>
    %62 = vector.extract_strided_slice %59 {offsets = [0, 0], sizes = [1, 32], strides = [1, 1]} : vector<1x96xf32> to vector<1x32xf32>
    %63 = vector.extract_strided_slice %59 {offsets = [0, 32], sizes = [1, 32], strides = [1, 1]} : vector<1x96xf32> to vector<1x32xf32>
    %64 = vector.extract_strided_slice %59 {offsets = [0, 64], sizes = [1, 32], strides = [1, 1]} : vector<1x96xf32> to vector<1x32xf32>
    %65 = arith.mulf %63, %47 : vector<1x32xf32>
    %66 = arith.mulf %62, %61 : vector<1x32xf32>
    %67 = arith.addf %65, %66 : vector<1x32xf32>
    %68 = math.tanh %67 : vector<1x32xf32>
    %69 = arith.mulf %64, %68 : vector<1x32xf32>
    %70 = vector.extract_strided_slice %7 {offsets = [3, 0], sizes = [1, 128], strides = [1, 1]} : vector<8x128xf32> to vector<1x128xf32>
    %c0_17 = arith.constant 0 : index
    %c0_18 = arith.constant 0 : index
    %71 = vector.load %arg3[%c0_17, %c0_18] : memref<32x128xf32, #tpu.memory_space<vmem>>, vector<32x128xf32>
    %cst_19 = arith.constant dense<0.000000e+00> : vector<1x128xf32>
    %72 = tpu.matmul %69, %71, %cst_19 {dimension_numbers = #tpu.dot_dimension_numbers<[1], [0], [0], [1], [0, 0, 1, 1], [], []>} : vector<1x32xf32>, vector<32x128xf32>, vector<1x128xf32> -> vector<1x128xf32>
    %73 = arith.addf %70, %72 : vector<1x128xf32>
    %74 = vector.extract_strided_slice %73 {offsets = [0, 0], sizes = [1, 96], strides = [1, 1]} : vector<1x128xf32> to vector<1x96xf32>
    %75 = arith.negf %74 : vector<1x96xf32>
    %76 = math.exp %75 : vector<1x96xf32>
    %cst_20 = arith.constant 1.000000e+00 : f32
    %77 = vector.broadcast %cst_20 : f32 to vector<1x96xf32>
    %78 = arith.addf %77, %76 : vector<1x96xf32>
    %79 = arith.divf %77, %78 : vector<1x96xf32>
    %80 = vector.extract_strided_slice %73 {offsets = [0, 96], sizes = [1, 32], strides = [1, 1]} : vector<1x128xf32> to vector<1x32xf32>
    %81 = math.tanh %80 : vector<1x32xf32>
    %82 = vector.extract_strided_slice %79 {offsets = [0, 0], sizes = [1, 32], strides = [1, 1]} : vector<1x96xf32> to vector<1x32xf32>
    %83 = vector.extract_strided_slice %79 {offsets = [0, 32], sizes = [1, 32], strides = [1, 1]} : vector<1x96xf32> to vector<1x32xf32>
    %84 = vector.extract_strided_slice %79 {offsets = [0, 64], sizes = [1, 32], strides = [1, 1]} : vector<1x96xf32> to vector<1x32xf32>
    %85 = arith.mulf %83, %67 : vector<1x32xf32>
    %86 = arith.mulf %82, %81 : vector<1x32xf32>
    %87 = arith.addf %85, %86 : vector<1x32xf32>
    %88 = math.tanh %87 : vector<1x32xf32>
    %89 = arith.mulf %84, %88 : vector<1x32xf32>
    %90 = vector.extract_strided_slice %7 {offsets = [4, 0], sizes = [1, 128], strides = [1, 1]} : vector<8x128xf32> to vector<1x128xf32>
    %c0_21 = arith.constant 0 : index
    %c0_22 = arith.constant 0 : index
    %91 = vector.load %arg3[%c0_21, %c0_22] : memref<32x128xf32, #tpu.memory_space<vmem>>, vector<32x128xf32>
    %cst_23 = arith.constant dense<0.000000e+00> : vector<1x128xf32>
    %92 = tpu.matmul %89, %91, %cst_23 {dimension_numbers = #tpu.dot_dimension_numbers<[1], [0], [0], [1], [0, 0, 1, 1], [], []>} : vector<1x32xf32>, vector<32x128xf32>, vector<1x128xf32> -> vector<1x128xf32>
    %93 = arith.addf %90, %92 : vector<1x128xf32>
    %94 = vector.extract_strided_slice %93 {offsets = [0, 0], sizes = [1, 96], strides = [1, 1]} : vector<1x128xf32> to vector<1x96xf32>
    %95 = arith.negf %94 : vector<1x96xf32>
    %96 = math.exp %95 : vector<1x96xf32>
    %cst_24 = arith.constant 1.000000e+00 : f32
    %97 = vector.broadcast %cst_24 : f32 to vector<1x96xf32>
    %98 = arith.addf %97, %96 : vector<1x96xf32>
    %99 = arith.divf %97, %98 : vector<1x96xf32>
    %100 = vector.extract_strided_slice %93 {offsets = [0, 96], sizes = [1, 32], strides = [1, 1]} : vector<1x128xf32> to vector<1x32xf32>
    %101 = math.tanh %100 : vector<1x32xf32>
    %102 = vector.extract_strided_slice %99 {offsets = [0, 0], sizes = [1, 32], strides = [1, 1]} : vector<1x96xf32> to vector<1x32xf32>
    %103 = vector.extract_strided_slice %99 {offsets = [0, 32], sizes = [1, 32], strides = [1, 1]} : vector<1x96xf32> to vector<1x32xf32>
    %104 = vector.extract_strided_slice %99 {offsets = [0, 64], sizes = [1, 32], strides = [1, 1]} : vector<1x96xf32> to vector<1x32xf32>
    %105 = arith.mulf %103, %87 : vector<1x32xf32>
    %106 = arith.mulf %102, %101 : vector<1x32xf32>
    %107 = arith.addf %105, %106 : vector<1x32xf32>
    %108 = math.tanh %107 : vector<1x32xf32>
    %109 = arith.mulf %104, %108 : vector<1x32xf32>
    %110 = vector.extract_strided_slice %7 {offsets = [5, 0], sizes = [1, 128], strides = [1, 1]} : vector<8x128xf32> to vector<1x128xf32>
    %c0_25 = arith.constant 0 : index
    %c0_26 = arith.constant 0 : index
    %111 = vector.load %arg3[%c0_25, %c0_26] : memref<32x128xf32, #tpu.memory_space<vmem>>, vector<32x128xf32>
    %cst_27 = arith.constant dense<0.000000e+00> : vector<1x128xf32>
    %112 = tpu.matmul %109, %111, %cst_27 {dimension_numbers = #tpu.dot_dimension_numbers<[1], [0], [0], [1], [0, 0, 1, 1], [], []>} : vector<1x32xf32>, vector<32x128xf32>, vector<1x128xf32> -> vector<1x128xf32>
    %113 = arith.addf %110, %112 : vector<1x128xf32>
    %114 = vector.extract_strided_slice %113 {offsets = [0, 0], sizes = [1, 96], strides = [1, 1]} : vector<1x128xf32> to vector<1x96xf32>
    %115 = arith.negf %114 : vector<1x96xf32>
    %116 = math.exp %115 : vector<1x96xf32>
    %cst_28 = arith.constant 1.000000e+00 : f32
    %117 = vector.broadcast %cst_28 : f32 to vector<1x96xf32>
    %118 = arith.addf %117, %116 : vector<1x96xf32>
    %119 = arith.divf %117, %118 : vector<1x96xf32>
    %120 = vector.extract_strided_slice %113 {offsets = [0, 96], sizes = [1, 32], strides = [1, 1]} : vector<1x128xf32> to vector<1x32xf32>
    %121 = math.tanh %120 : vector<1x32xf32>
    %122 = vector.extract_strided_slice %119 {offsets = [0, 0], sizes = [1, 32], strides = [1, 1]} : vector<1x96xf32> to vector<1x32xf32>
    %123 = vector.extract_strided_slice %119 {offsets = [0, 32], sizes = [1, 32], strides = [1, 1]} : vector<1x96xf32> to vector<1x32xf32>
    %124 = vector.extract_strided_slice %119 {offsets = [0, 64], sizes = [1, 32], strides = [1, 1]} : vector<1x96xf32> to vector<1x32xf32>
    %125 = arith.mulf %123, %107 : vector<1x32xf32>
    %126 = arith.mulf %122, %121 : vector<1x32xf32>
    %127 = arith.addf %125, %126 : vector<1x32xf32>
    %128 = math.tanh %127 : vector<1x32xf32>
    %129 = arith.mulf %124, %128 : vector<1x32xf32>
    %130 = vector.extract_strided_slice %7 {offsets = [6, 0], sizes = [1, 128], strides = [1, 1]} : vector<8x128xf32> to vector<1x128xf32>
    %c0_29 = arith.constant 0 : index
    %c0_30 = arith.constant 0 : index
    %131 = vector.load %arg3[%c0_29, %c0_30] : memref<32x128xf32, #tpu.memory_space<vmem>>, vector<32x128xf32>
    %cst_31 = arith.constant dense<0.000000e+00> : vector<1x128xf32>
    %132 = tpu.matmul %129, %131, %cst_31 {dimension_numbers = #tpu.dot_dimension_numbers<[1], [0], [0], [1], [0, 0, 1, 1], [], []>} : vector<1x32xf32>, vector<32x128xf32>, vector<1x128xf32> -> vector<1x128xf32>
    %133 = arith.addf %130, %132 : vector<1x128xf32>
    %134 = vector.extract_strided_slice %133 {offsets = [0, 0], sizes = [1, 96], strides = [1, 1]} : vector<1x128xf32> to vector<1x96xf32>
    %135 = arith.negf %134 : vector<1x96xf32>
    %136 = math.exp %135 : vector<1x96xf32>
    %cst_32 = arith.constant 1.000000e+00 : f32
    %137 = vector.broadcast %cst_32 : f32 to vector<1x96xf32>
    %138 = arith.addf %137, %136 : vector<1x96xf32>
    %139 = arith.divf %137, %138 : vector<1x96xf32>
    %140 = vector.extract_strided_slice %133 {offsets = [0, 96], sizes = [1, 32], strides = [1, 1]} : vector<1x128xf32> to vector<1x32xf32>
    %141 = math.tanh %140 : vector<1x32xf32>
    %142 = vector.extract_strided_slice %139 {offsets = [0, 0], sizes = [1, 32], strides = [1, 1]} : vector<1x96xf32> to vector<1x32xf32>
    %143 = vector.extract_strided_slice %139 {offsets = [0, 32], sizes = [1, 32], strides = [1, 1]} : vector<1x96xf32> to vector<1x32xf32>
    %144 = vector.extract_strided_slice %139 {offsets = [0, 64], sizes = [1, 32], strides = [1, 1]} : vector<1x96xf32> to vector<1x32xf32>
    %145 = arith.mulf %143, %127 : vector<1x32xf32>
    %146 = arith.mulf %142, %141 : vector<1x32xf32>
    %147 = arith.addf %145, %146 : vector<1x32xf32>
    %148 = math.tanh %147 : vector<1x32xf32>
    %149 = arith.mulf %144, %148 : vector<1x32xf32>
    %150 = vector.extract_strided_slice %7 {offsets = [7, 0], sizes = [1, 128], strides = [1, 1]} : vector<8x128xf32> to vector<1x128xf32>
    %c0_33 = arith.constant 0 : index
    %c0_34 = arith.constant 0 : index
    %151 = vector.load %arg3[%c0_33, %c0_34] : memref<32x128xf32, #tpu.memory_space<vmem>>, vector<32x128xf32>
    %cst_35 = arith.constant dense<0.000000e+00> : vector<1x128xf32>
    %152 = tpu.matmul %149, %151, %cst_35 {dimension_numbers = #tpu.dot_dimension_numbers<[1], [0], [0], [1], [0, 0, 1, 1], [], []>} : vector<1x32xf32>, vector<32x128xf32>, vector<1x128xf32> -> vector<1x128xf32>
    %153 = arith.addf %150, %152 : vector<1x128xf32>
    %154 = vector.extract_strided_slice %153 {offsets = [0, 0], sizes = [1, 96], strides = [1, 1]} : vector<1x128xf32> to vector<1x96xf32>
    %155 = arith.negf %154 : vector<1x96xf32>
    %156 = math.exp %155 : vector<1x96xf32>
    %cst_36 = arith.constant 1.000000e+00 : f32
    %157 = vector.broadcast %cst_36 : f32 to vector<1x96xf32>
    %158 = arith.addf %157, %156 : vector<1x96xf32>
    %159 = arith.divf %157, %158 : vector<1x96xf32>
    %160 = vector.extract_strided_slice %153 {offsets = [0, 96], sizes = [1, 32], strides = [1, 1]} : vector<1x128xf32> to vector<1x32xf32>
    %161 = math.tanh %160 : vector<1x32xf32>
    %162 = vector.extract_strided_slice %159 {offsets = [0, 0], sizes = [1, 32], strides = [1, 1]} : vector<1x96xf32> to vector<1x32xf32>
    %163 = vector.extract_strided_slice %159 {offsets = [0, 32], sizes = [1, 32], strides = [1, 1]} : vector<1x96xf32> to vector<1x32xf32>
    %164 = vector.extract_strided_slice %159 {offsets = [0, 64], sizes = [1, 32], strides = [1, 1]} : vector<1x96xf32> to vector<1x32xf32>
    %165 = arith.mulf %163, %147 : vector<1x32xf32>
    %166 = arith.mulf %162, %161 : vector<1x32xf32>
    %167 = arith.addf %165, %166 : vector<1x32xf32>
    %168 = math.tanh %167 : vector<1x32xf32>
    %169 = arith.mulf %164, %168 : vector<1x32xf32>
    %170 = tpu.concatenate %29, %49, %69, %89, %109, %129, %149, %169 in 0 : vector<1x32xf32>, vector<1x32xf32>, vector<1x32xf32>, vector<1x32xf32>, vector<1x32xf32>, vector<1x32xf32>, vector<1x32xf32>, vector<1x32xf32> -> vector<8x32xf32>
    %c0_37 = arith.constant 0 : index
    %c0_38 = arith.constant 0 : index
    %171 = vector.load %arg4[%c0_37, %c0_38] : memref<32x3xf32, #tpu.memory_space<vmem>>, vector<32x3xf32>
    %cst_39 = arith.constant dense<0.000000e+00> : vector<8x3xf32>
    %172 = tpu.matmul %170, %171, %cst_39 {dimension_numbers = #tpu.dot_dimension_numbers<[1], [0], [0], [1], [0, 0, 1, 1], [], []>} : vector<8x32xf32>, vector<32x3xf32>, vector<8x3xf32> -> vector<8x3xf32>
    %c0_40 = arith.constant 0 : index
    %c0_41 = arith.constant 0 : index
    %173 = vector.load %arg5[%c0_40, %c0_41] : memref<1x3xf32, #tpu.memory_space<vmem>>, vector<1x3xf32>
    %174 = vector.broadcast %173 : vector<1x3xf32> to vector<8x3xf32>
    %175 = arith.addf %172, %174 : vector<8x3xf32>
    %c0_42 = arith.constant 0 : index
    %c0_43 = arith.constant 0 : index
    %176 = vector.load %arg6[%c0_42, %c0_43] : memref<8x3xf32, #tpu.memory_space<vmem>>, vector<8x3xf32>
    tpu.vector_store %arg6[%c0_42, %c0_43], %175 {strides = array<i32>} : memref<8x3xf32, #tpu.memory_space<vmem>>, vector<8x3xf32>,
    return
  }
  func.func @transform_0(%arg0: i32) -> (i32, i32) {
    %c0_i32 = arith.constant 0 : i32
    %c0_i32_0 = arith.constant 0 : i32
    %c0_i32_1 = arith.constant 0 : i32
    return %c0_i32, %c0_i32_0 : i32, i32
  }
  func.func @transform_1(%arg0: i32) -> (i32, i32) {
    %c0_i32 = arith.constant 0 : i32
    %c0_i32_0 = arith.constant 0 : i32
    %c0_i32_1 = arith.constant 0 : i32
    return %c0_i32, %c0_i32_0 : i32, i32
  }
  func.func @transform_2(%arg0: i32) -> (i32, i32) {
    %c0_i32 = arith.constant 0 : i32
    %c0_i32_0 = arith.constant 0 : i32
    %c0_i32_1 = arith.constant 0 : i32
    return %c0_i32, %c0_i32_0 : i32, i32
  }
  func.func @transform_3(%arg0: i32) -> (i32, i32) {
    %c0_i32 = arith.constant 0 : i32
    %c0_i32_0 = arith.constant 0 : i32
    %c0_i32_1 = arith.constant 0 : i32
    return %c0_i32, %c0_i32_0 : i32, i32
  }
  func.func @transform_4(%arg0: i32) -> (i32, i32) {
    %c0_i32 = arith.constant 0 : i32
    %c0_i32_0 = arith.constant 0 : i32
    %c0_i32_1 = arith.constant 0 : i32
    return %c0_i32, %c0_i32_0 : i32, i32
  }
  func.func @transform_5(%arg0: i32) -> (i32, i32) {
    %c0_i32 = arith.constant 0 : i32
    %c0_i32_0 = arith.constant 0 : i32
    %c0_i32_1 = arith.constant 0 : i32
    return %c0_i32, %c0_i32_0 : i32, i32
  }
}

</mosaic_0001>

<bundles_post_ra>
// kernel: lstm_tagger_forward.1
= control target key start
LH: loop header
LB: loop body
LE: loop exit
PB: predicated region body
PF: predicated region fallthrough
CT: control target
= control target key end

     0   :  { %10 = vsyncpa [#allocation3], 0  ;;  %s1479_s18 = smov [#allocation2]   ;;  %s1685_s0 = inlined_call_operand.vmem [shape: s32[8,1], index: 0, kind: input, shape index: {}]   ;;  %s1686_s1 = inlined_call_operand.hbm [shape: f32[128,128], index: 1, kind: input, shape index: {}]   ;;  %s1687_s2 = inlined_call_operand.vmem [shape: f32[32,128], index: 2, kind: input, shape index: {}]   ;;  %s1688_s3 = inlined_call_operand.vmem [shape: f32[32,3], index: 3, kind: input, shape index: {}]   ;;  %s1689_s4 = inlined_call_operand.vmem [shape: f32[1,3], index: 4, kind: input, shape index: {}]   ;;  %s1690_s5 = inlined_call_operand.vmem [shape: f32[8,3], index: 5, kind: output, shape index: {}]  }
   0x1   :  { %s18_s19 = sshll.u32 %s1479_s18, 4  ;;  %s1455_s22 = scalar_lea.hbm %s1686_s1, 2048  ;;  %s19_s19 = int_to_ptr.vmem [resolvable:$true] %s18_s19 }
   0x2   :  { %p1456_p0 = scmp.ne.s32.totalorder %s1686_s1, %s1455_s22  ;;  %p1459_p1 = scmp.lt.u32.totalorder %s1455_s22, %s1686_s1 }
   0x4   :  { %p1461_p2 = pnand %p1459_p1, %p1456_p0 }
   0x6   :  { %1464 = shalt.err (!%p1461_p2)
}
   0x7   :  { %s1465_s27 = scalar_lea.vmem %s19_s19, 2048  ;;  %p1470_p4 = scmp.lt.s32.totalorder %s19_s19, %s19_s19 }
   0x8   :  { %p1466_p3 = scmp.ne.s32.totalorder %s19_s19, %s1465_s27  ;;  %p1471_p5 = scmp.lt.s32.totalorder %s1465_s27, %s1465_s27 }
   0xa   :  { %p1472_p6 = por %p1471_p5, %p1470_p4 }
   0xc   :  { %p1473_p7 = pnand %p1472_p6, %p1466_p3 }
   0xe   :  { %1476 = shalt.err (!%p1473_p7)
}
   0xf   :  { %s1480_s28 = smov 128   ;;  %s1481_s29 = smov 8  }
  0x10   :  { %24 = dma.hbm_to_vmem [thread:$0]  %s1686_s1, 2048, %s19_s19, [#allocation3], %s1480_s28, %s1480_s28, %s1481_s29  }
  0x11   :  { %1477 = dma.done.wait [#allocation3], 2048  }
  0x12   :  { %1478 = vsyncadd [#allocation3], 4294965248  ;;  %v1482_v0 = vmov 0   ;;  %v1483_v1 = vmov 0.0|0.0   ;;  %vm1484_vm0 = vmmov 0   ;;  %v1485_v2 = vmov 0.0  }
  0x13   :  { %1390 = vset.pattern.permute.xlu0 %v1482_v0  ;;  %1302 = vmatprep.subr.bf16.mxu0 %v1483_v1  ;;  %v36_v3 = vld [vmem:[%s1685_s0] sm:$0xff]  ;;  %v44_v5 = vld [vmem:[#allocation2 + $0x8] sm:$0xff]  ;;  %v45_v7 = vld [vmem:[#allocation2 + $0x10] sm:$0xff]  ;;  %v34_v34 = vlaneseq  ;;  %v1486_v37 = vmov 1.0   ;;  %s1488_s15 = smov 64   ;;  %vm133_vm2 = vcmask 261120  }
  0x14   :  { %1326 = vmatprep.subr.bf16.mxu1 %v1483_v1  ;;  %1211 = vmatprep.mubr.msk.f32.mxu1 %vm1484_vm0, %v1485_v2  ;;  %v43_v4 = vld [vmem:[#allocation2] sm:$0xff]  ;;  %v46_v8 = vld [vmem:[#allocation2 + $0x18] sm:$0xff]  ;;  %v48_v11 = vld [vmem:[#allocation2 + $0x28] sm:$0xff]  ;;  %vm980_vm3 = vcmask 1040384   ;;  %vm982_vm4 = vcmask 1041408   ;;  %vm984_vm5 = vcmask 1042432  }
  0x15   :  { %1200 = vmatprep.mubr.msk.f32.mxu0 %vm1484_vm0, %v1485_v2  ;;  %38 = vperm.xlu0 %1390, %v36_v3   ;;  %v1303_v6 = vpack.c.bf16 %v44_v5, %v43_v4  ;;  %v1306_v9 = vpack.c.bf16 %v46_v8, %v45_v7  ;;  %v47_v10 = vld [vmem:[#allocation2 + $0x20] sm:$0xff]  ;;  %v130_v13 = vld [vmem:[%s1687_s2 + $0x8] sm:$0xff]  ;;  %v131_v15 = vld [vmem:[%s1687_s2 + $0x10] sm:$0xff]  ;;  %v35_v35 = vand.u32 127, %v34_v34  ;;  %vm986_vm6 = vcmask 1043456  }
  0x16   :  { %v129_v12 = vld [vmem:[%s1687_s2] sm:$0xff]  ;;  %v132_v16 = vld [vmem:[%s1687_s2 + $0x18] sm:$0xff]  ;;  %v1309_v17 = vpack.c.bf16 %v48_v11, %v47_v10  ;;  %v49_v19 = vld [vmem:[#allocation2 + $0x30] sm:$0xff]  ;;  %s1487_s2 = smov 32   ;;  %vm988_vm7 = vcmask 1044480   ;;  %vm990_vm8 = vcmask 1045504  }
  0x17   :  { %1304 = vmatpush3.bf16.msra.mxu0 %v1303_v6  ;;  %v1547_v14 = vpack.c.bf16 %v130_v13, %v129_v12  ;;  %v1556_v18 = vpack.c.bf16 %v132_v16, %v131_v15  ;;  %v50_v20 = vld [vmem:[#allocation2 + $0x38] sm:$0xff]  ;;  %v51_v22 = vld [vmem:[#allocation2 + $0x40] sm:$0xff]  ;;  %v52_v23 = vld [vmem:[#allocation2 + $0x48] sm:$0xff]  ;;  %vm992_vm9 = vcmask 1046528   ;;  %vm1080_vm10 = vcmask 23552  }
  0x18   :  { %1305 = vmatprep.subr.bf16.mxu0 %v1483_v1  ;;  %v1312_v21 = vpack.c.bf16 %v50_v20, %v49_v19  ;;  %v1315_v24 = vpack.c.bf16 %v52_v23, %v51_v22  ;;  %v53_v25 = vld [vmem:[#allocation2 + $0x50] sm:$0xff]  ;;  %v54_v26 = vld [vmem:[#allocation2 + $0x58] sm:$0xff]  ;;  %v55_v28 = vld [vmem:[#allocation2 + $0x60] sm:$0xff] }
  0x19   :  { %1328 = vmatpush3.bf16.msra.mxu1 %v1547_v14  ;;  %v1318_v27 = vpack.c.bf16 %v54_v26, %v53_v25  ;;  %v56_v29 = vld [vmem:[#allocation2 + $0x68] sm:$0xff]  ;;  %v57_v31 = vld [vmem:[#allocation2 + $0x70] sm:$0xff]  ;;  %v58_v32 = vld [vmem:[#allocation2 + $0x78] sm:$0xff] }
  0x1a   :  { %1329 = vmatprep.subr.bf16.mxu1 %v1483_v1  ;;  %v1321_v30 = vpack.c.bf16 %v56_v29, %v55_v28  ;;  %v1324_v33 = vpack.c.bf16 %v58_v32, %v57_v31 }
  0x1b   :  { %1307 = vmatpush3.bf16.msra.mxu0 %v1306_v9 }
  0x1c   :  { %1308 = vmatprep.subr.bf16.mxu0 %v1483_v1 }
  0x1d   :  { %1331 = vmatpush3.bf16.msra.mxu1 %v1556_v18 }
  0x1e   :  { %1332 = vmatprep.subr.bf16.mxu1 %v1483_v1 }
  0x1f   :  { %1310 = vmatpush3.bf16.msra.mxu0 %v1309_v17 }
  0x20   :  { %1311 = vmatprep.subr.bf16.mxu0 %v1483_v1  ;;  %1212 = vmatmul.mubr.f32.vlgmr.msra.gmra.mrb[0].mxu1 %v1485_v2 }
  0x21   :  { %1334 = vmatpush3.bf16.msra.mxu1 %v1547_v14  ;;  %1222 = vmatprep.mubr.msk.f32.mxu1 %vm1484_vm0, %v1485_v2 }
  0x22   :  { %1335 = vmatprep.subr.bf16.mxu1 %v1483_v1 }
  0x23   :  { %1313 = vmatpush3.bf16.msra.mxu0 %v1312_v21 }
  0x24   :  { %1314 = vmatprep.subr.bf16.mxu0 %v1483_v1 }
  0x25   :  { %1337 = vmatpush3.bf16.msra.mxu1 %v1556_v18 }
  0x26   :  { %1338 = vmatprep.subr.bf16.mxu1 %v1483_v1 }
  0x27   :  { %1316 = vmatpush3.bf16.msra.mxu0 %v1315_v24 }
  0x28   :  { %1317 = vmatprep.subr.bf16.mxu0 %v1483_v1 }
  0x2b   :  { %1319 = vmatpush3.bf16.msra.mxu0 %v1318_v27 }
  0x2c   :  { %1320 = vmatprep.subr.bf16.mxu0 %v1483_v1 }
  0x2f   :  { %1322 = vmatpush3.bf16.msra.mxu0 %v1321_v30 }
  0x30   :  { %1323 = vmatprep.subr.bf16.mxu0 %v1483_v1 }
  0x33   :  { %1325 = vmatpush3.bf16.msra.mxu0 %v1324_v33 }
  0x34   :  { %1350 = vmatprep.subr.bf16.mxu0 %v1483_v1 }
  0x94   :  { %v39_v36 = vpop.permute.xlu0 %38 }
  0x95   :  { %vm40_vm1 = vcmp.eq.s32.totalorder %v35_v35, %v39_v36 }
  0x96   :  { %1201 = vmatmul.mubr.msk.f32.vlgmr.msra.gmra.mrb[0].mxu0 %vm40_vm1, %v1486_v37 }
  0x97   :  { %1352 = vmatpush3.bf16.msra.mxu0 %v1547_v14  ;;  %1255 = vmatprep.mubr.msk.f32.mxu0 %vm1484_vm0, %v1485_v2 }
  0x98   :  { %1353 = vmatprep.subr.bf16.mxu0 %v1483_v1 }
  0x9b   :  { %1355 = vmatpush3.bf16.msra.mxu0 %v1556_v18 }
  0x9c   :  { %1362 = vmatprep.subr.bf16.mxu0 %v1483_v1 }
  0xf3   :  { %v203_v38 = vpop.f32.mrb[0].mxu1 }
  0xf4   :  { %v1213_v39 = vpop.f32.mrb[1].mxu1 }
 0x169   :  { %v1581_v40 = vpop.f32.mrb[0].mxu0 }
 0x16a   :  { %v207_v41 = vadd.f32 %v203_v38, %v1581_v40  ;;  %v1202_v42 = vpop.f32.mrb[1].mxu0 }
 0x16c   :  { %1391 = vtanh.f32 %v207_v41  ;;  %v1089_v44 = vmul.f32 -1.442695, %v207_v41 }
 0x16e   :  { %1393 = vpow2.f32 %v1089_v44 }
 0x176   :  { %v1392_v43 = vpop.eup %1391 }
 0x177   :  { %217 = vrot.lane.b32.xlu0 %v1392_v43, %s1487_s2 }
 0x178   :  { %v1394_v45 = vpop.eup %1393 }
 0x179   :  { %v211_v46 = vadd.f32 1.0, %v1394_v45 }
 0x17b   :  { %1395 = vrcp.f32 %v211_v46 }
 0x185   :  { %v1396_v47 = vpop.eup %1395 }
 0x186   :  { %v215_v50 = vmul.f32 0.0, %v1396_v47 }
 0x1e9   :  { %v218_v48 = vpop.permute.xlu0 %217 }
 0x1ea   :  { %v220_v49 = vmul.f32 %v1396_v47, %v218_v48 }
 0x1ec   :  { %222 = vrot.lane.b32.xlu1 %v220_v49, %s1487_s2 }
 0x25e   :  { %v223_v51 = vpop.permute.xlu1 %222 }
 0x25f   :  { %v225_v52 = vadd.f32 %v223_v51, %v215_v50 }
 0x261   :  { %1397 = vtanh.f32 %v225_v52  ;;  %v319_v6 = vrot.slane %v225_v52, 7 }
 0x26b   :  { %v1398_v53 = vpop.eup %1397 }
 0x26c   :  { %228 = vrot.lane.b32.xlu1 %v1398_v53, %s1487_s2 }
 0x2de   :  { %v229_v54 = vpop.permute.xlu1 %228 }
 0x2df   :  { %v1587_v55 = vmul.f32 %v1396_v47, %v229_v54 }
 0x2e1   :  { %233 = vrot.lane.b32.xlu0 %v1587_v55, %s1488_s15 }
 0x353   :  { %v234_v56 = vpop.permute.xlu0 %233 }
 0x354   :  { %1223 = vmatmul.mubr.msk.f32.vlgmr.msra.gmra.mrb[2].mxu1 %vm133_vm2, %v234_v56 }
 0x355   :  { %1340 = vmatpush3.bf16.msra.mxu1 %v1547_v14  ;;  %1233 = vmatprep.mubr.msk.f32.mxu1 %vm1484_vm0, %v1485_v2 }
 0x356   :  { %1341 = vmatprep.subr.bf16.mxu1 %v1483_v1 }
 0x359   :  { %1343 = vmatpush3.bf16.msra.mxu1 %v1556_v18 }
 0x35a   :  { %1344 = vmatprep.subr.bf16.mxu1 %v1483_v1 }
 0x427   :  { %v303_v57 = vpop.f32.mrb[2].mxu1 }
 0x428   :  { %v308_v58 = vrot.slane %v303_v57, 7  ;;  %v1224_v59 = vpop.f32.mrb[3].mxu1 }
 0x42a   :  { %v310_v60 = vadd.f32 %v308_v58, %v1581_v40 }
 0x42c   :  { %1399 = vtanh.f32 %v310_v60  ;;  %v1091_v62 = vmul.f32 -1.442695, %v310_v60 }
 0x42e   :  { %1401 = vpow2.f32 %v1091_v62 }
 0x436   :  { %v1400_v61 = vpop.eup %1399 }
 0x437   :  { %323 = vrot.lane.b32.xlu1 %v1400_v61, %s1487_s2 }
 0x438   :  { %v1402_v63 = vpop.eup %1401 }
 0x439   :  { %v314_v0 = vadd.f32 1.0, %v1402_v63 }
 0x43b   :  { %1403 = vrcp.f32 %v314_v0 }
 0x445   :  { %v1404_v3 = vpop.eup %1403 }
 0x446   :  { %v321_v7 = vmul.f32 %v1404_v3, %v319_v6 }
 0x4a9   :  { %v324_v4 = vpop.permute.xlu1 %323 }
 0x4aa   :  { %v326_v5 = vmul.f32 %v1404_v3, %v324_v4 }
 0x4ac   :  { %328 = vrot.lane.b32.xlu0 %v326_v5, %s1487_s2 }
 0x51e   :  { %v329_v8 = vpop.permute.xlu0 %328 }
 0x51f   :  { %v331_v9 = vadd.f32 %v329_v8, %v321_v7 }
 0x521   :  { %1405 = vtanh.f32 %v331_v9  ;;  %v426_v28 = vrot.slane %v331_v9, 7 }
 0x52b   :  { %v1406_v10 = vpop.eup %1405 }
 0x52c   :  { %334 = vrot.lane.b32.xlu1 %v1406_v10, %s1487_s2 }
 0x59e   :  { %v335_v11 = vpop.permute.xlu1 %334 }
 0x59f   :  { %v337_v12 = vmul.f32 %v1404_v3, %v335_v11 }
 0x5a1   :  { %v339_v13 = vrot.slane %v337_v12, 1  ;;  %v981_v35 = vsel %vm980_vm3, %v1587_v55, %v337_v12 }
 0x5a3   :  { %340 = vrot.lane.b32.xlu0 %v339_v13, %s1488_s15 }
 0x615   :  { %v341_v15 = vpop.permute.xlu0 %340 }
 0x616   :  { %1234 = vmatmul.mubr.msk.f32.vlgmr.msra.gmra.mrb[4].mxu1 %vm133_vm2, %v341_v15 }
 0x617   :  { %1346 = vmatpush3.bf16.msra.mxu1 %v1547_v14  ;;  %1244 = vmatprep.mubr.msk.f32.mxu1 %vm1484_vm0, %v1485_v2 }
 0x618   :  { %1347 = vmatprep.subr.bf16.mxu1 %v1483_v1 }
 0x61b   :  { %1349 = vmatpush3.bf16.msra.mxu1 %v1556_v18 }
 0x61c   :  { %1356 = vmatprep.subr.bf16.mxu1 %v1483_v1 }
 0x6e9   :  { %v410_v16 = vpop.f32.mrb[4].mxu1 }
 0x6ea   :  { %v415_v17 = vrot.slane %v410_v16, 6  ;;  %v1235_v19 = vpop.f32.mrb[5].mxu1 }
 0x6ec   :  { %v417_v20 = vadd.f32 %v415_v17, %v1581_v40 }
 0x6ee   :  { %1407 = vtanh.f32 %v417_v20  ;;  %v1093_v22 = vmul.f32 -1.442695, %v417_v20 }
 0x6f0   :  { %1409 = vpow2.f32 %v1093_v22 }
 0x6f8   :  { %v1408_v21 = vpop.eup %1407 }
 0x6f9   :  { %430 = vrot.lane.b32.xlu1 %v1408_v21, %s1487_s2 }
 0x6fa   :  { %v1410_v23 = vpop.eup %1409 }
 0x6fb   :  { %v421_v24 = vadd.f32 1.0, %v1410_v23 }
 0x6fd   :  { %1411 = vrcp.f32 %v421_v24 }
 0x707   :  { %v1412_v25 = vpop.eup %1411 }
 0x708   :  { %v428_v29 = vmul.f32 %v1412_v25, %v426_v28 }
 0x76b   :  { %v431_v26 = vpop.permute.xlu1 %430 }
 0x76c   :  { %v433_v27 = vmul.f32 %v1412_v25, %v431_v26 }
 0x76e   :  { %435 = vrot.lane.b32.xlu0 %v433_v27, %s1487_s2 }
 0x7e0   :  { %v436_v30 = vpop.permute.xlu0 %435 }
 0x7e1   :  { %v438_v31 = vadd.f32 %v436_v30, %v428_v29 }
 0x7e3   :  { %1413 = vtanh.f32 %v438_v31  ;;  %v533_v51 = vrot.slane %v438_v31, 7 }
 0x7ed   :  { %v1414_v32 = vpop.eup %1413 }
 0x7ee   :  { %441 = vrot.lane.b32.xlu1 %v1414_v32, %s1487_s2 }
 0x860   :  { %v442_v33 = vpop.permute.xlu1 %441 }
 0x861   :  { %v444_v34 = vmul.f32 %v1412_v25, %v442_v33 }
 0x863   :  { %v446_v36 = vrot.slane %v444_v34, 2  ;;  %v983_v37 = vsel %vm982_vm4, %v981_v35, %v444_v34 }
 0x865   :  { %447 = vrot.lane.b32.xlu0 %v446_v36, %s1488_s15 }
 0x8d7   :  { %v448_v38 = vpop.permute.xlu0 %447 }
 0x8d8   :  { %1245 = vmatmul.mubr.msk.f32.vlgmr.msra.gmra.mrb[6].mxu1 %vm133_vm2, %v448_v38 }
 0x8d9   :  { %1358 = vmatpush3.bf16.msra.mxu1 %v1547_v14  ;;  %1266 = vmatprep.mubr.msk.f32.mxu1 %vm1484_vm0, %v1485_v2 }
 0x8da   :  { %1359 = vmatprep.subr.bf16.mxu1 %v1483_v1 }
 0x8dd   :  { %1361 = vmatpush3.bf16.msra.mxu1 %v1556_v18 }
 0x8de   :  { %1368 = vmatprep.subr.bf16.mxu1 %v1483_v1 }
 0x9ab   :  { %v517_v39 = vpop.f32.mrb[6].mxu1 }
 0x9ac   :  { %v522_v41 = vrot.slane %v517_v39, 5  ;;  %v1246_v42 = vpop.f32.mrb[7].mxu1 }
 0x9ae   :  { %v524_v43 = vadd.f32 %v522_v41, %v1581_v40 }
 0x9b0   :  { %1415 = vtanh.f32 %v524_v43  ;;  %v1095_v45 = vmul.f32 -1.442695, %v524_v43 }
 0x9b2   :  { %1417 = vpow2.f32 %v1095_v45 }
 0x9ba   :  { %v1416_v44 = vpop.eup %1415 }
 0x9bb   :  { %537 = vrot.lane.b32.xlu1 %v1416_v44, %s1487_s2 }
 0x9bc   :  { %v1418_v46 = vpop.eup %1417 }
 0x9bd   :  { %v528_v47 = vadd.f32 1.0, %v1418_v46 }
 0x9bf   :  { %1419 = vrcp.f32 %v528_v47 }
 0x9c9   :  { %v1420_v48 = vpop.eup %1419 }
 0x9ca   :  { %v535_v52 = vmul.f32 %v1420_v48, %v533_v51 }
 0xa2d   :  { %v538_v49 = vpop.permute.xlu1 %537 }
 0xa2e   :  { %v540_v50 = vmul.f32 %v1420_v48, %v538_v49 }
 0xa30   :  { %542 = vrot.lane.b32.xlu0 %v540_v50, %s1487_s2 }
 0xaa2   :  { %v543_v53 = vpop.permute.xlu0 %542 }
 0xaa3   :  { %v545_v54 = vadd.f32 %v543_v53, %v535_v52 }
 0xaa5   :  { %1421 = vtanh.f32 %v545_v54  ;;  %v640_v10 = vrot.slane %v545_v54, 7 }
 0xaaf   :  { %v1422_v55 = vpop.eup %1421 }
 0xab0   :  { %548 = vrot.lane.b32.xlu1 %v1422_v55, %s1487_s2 }
 0xb22   :  { %v549_v56 = vpop.permute.xlu1 %548 }
 0xb23   :  { %v551_v57 = vmul.f32 %v1420_v48, %v549_v56 }
 0xb25   :  { %v553_v58 = vrot.slane %v551_v57, 3  ;;  %v985_v59 = vsel %vm984_vm5, %v983_v37, %v551_v57 }
 0xb27   :  { %554 = vrot.lane.b32.xlu0 %v553_v58, %s1488_s15 }
 0xb99   :  { %v555_v60 = vpop.permute.xlu0 %554 }
 0xb9a   :  { %1256 = vmatmul.mubr.msk.f32.vlgmr.msra.gmra.mrb[2].mxu0 %vm133_vm2, %v555_v60 }
 0xb9b   :  { %1364 = vmatpush3.bf16.msra.mxu0 %v1547_v14  ;;  %1277 = vmatprep.mubr.msk.f32.mxu0 %vm1484_vm0, %v1485_v2 }
 0xb9c   :  { %1365 = vmatprep.subr.bf16.mxu0 %v1483_v1 }
 0xb9f   :  { %1367 = vmatpush3.bf16.msra.mxu0 %v1556_v18 }
 0xba0   :  { %1374 = vmatprep.subr.bf16.mxu0 %v1483_v1 }
 0xc6d   :  { %v624_v61 = vpop.f32.mrb[2].mxu0 }
 0xc6e   :  { %v629_v62 = vrot.slane %v624_v61, 4  ;;  %v1257_v63 = vpop.f32.mrb[3].mxu0 }
 0xc70   :  { %v631_v0 = vadd.f32 %v629_v62, %v1581_v40 }
 0xc72   :  { %1423 = vtanh.f32 %v631_v0  ;;  %v1097_v4 = vmul.f32 -1.442695, %v631_v0 }
 0xc74   :  { %1425 = vpow2.f32 %v1097_v4 }
 0xc7c   :  { %v1424_v3 = vpop.eup %1423 }
 0xc7d   :  { %644 = vrot.lane.b32.xlu1 %v1424_v3, %s1487_s2 }
 0xc7e   :  { %v1426_v5 = vpop.eup %1425 }
 0xc7f   :  { %v635_v6 = vadd.f32 1.0, %v1426_v5 }
 0xc81   :  { %1427 = vrcp.f32 %v635_v6 }
 0xc8b   :  { %v1428_v7 = vpop.eup %1427 }
 0xc8c   :  { %v642_v11 = vmul.f32 %v1428_v7, %v640_v10 }
 0xcef   :  { %v645_v8 = vpop.permute.xlu1 %644 }
 0xcf0   :  { %v647_v9 = vmul.f32 %v1428_v7, %v645_v8 }
 0xcf2   :  { %649 = vrot.lane.b32.xlu0 %v647_v9, %s1487_s2 }
 0xd64   :  { %v650_v12 = vpop.permute.xlu0 %649 }
 0xd65   :  { %v652_v13 = vadd.f32 %v650_v12, %v642_v11 }
 0xd67   :  { %1429 = vtanh.f32 %v652_v13 }
 0xd71   :  { %v1430_v15 = vpop.eup %1429 }
 0xd72   :  { %655 = vrot.lane.b32.xlu1 %v1430_v15, %s1487_s2 }
 0xde4   :  { %v656_v16 = vpop.permute.xlu1 %655 }
 0xde5   :  { %v658_v17 = vmul.f32 %v1428_v7, %v656_v16  ;;  %v995_v16 = vld [vmem:[%s1688_s3 + $0x8] sm:$0xff] }
 0xde7   :  { %v660_v19 = vrot.slane %v658_v17, 4  ;;  %v987_v20 = vsel %vm986_vm6, %v985_v59, %v658_v17  ;;  %v996_v17 = vld [vmem:[%s1688_s3 + $0x10] sm:$0xff] }
 0xde9   :  { %661 = vrot.lane.b32.xlu0 %v660_v19, %s1488_s15 }
 0xe5b   :  { %v662_v21 = vpop.permute.xlu0 %661 }
 0xe5c   :  { %1267 = vmatmul.mubr.msk.f32.vlgmr.msra.gmra.mrb[8].mxu1 %vm133_vm2, %v662_v21 }
 0xe5d   :  { %1370 = vmatpush3.bf16.msra.mxu1 %v1547_v14  ;;  %1288 = vmatprep.mubr.msk.f32.mxu1 %vm1484_vm0, %v1485_v2 }
 0xe5e   :  { %1371 = vmatprep.subr.bf16.mxu1 %v1483_v1 }
 0xe61   :  { %1373 = vmatpush3.bf16.msra.mxu1 %v1556_v18  ;;  %v747_v18 = vrot.slane %v652_v13, 7 }
 0xf2f   :  { %v731_v22 = vpop.f32.mrb[8].mxu1 }
 0xf30   :  { %v736_v23 = vrot.slane %v731_v22, 3  ;;  %v1268_v24 = vpop.f32.mrb[9].mxu1 }
 0xf32   :  { %v738_v25 = vadd.f32 %v736_v23, %v1581_v40 }
 0xf34   :  { %1431 = vtanh.f32 %v738_v25  ;;  %v1099_v27 = vmul.f32 -1.442695, %v738_v25 }
 0xf36   :  { %1433 = vpow2.f32 %v1099_v27  ;;  %v1104_v27 = vld [vmem:[%s1689_s4] ss:$0 sm:$0xff] }
 0xf3e   :  { %v1432_v26 = vpop.eup %1431 }
 0xf3f   :  { %751 = vrot.lane.b32.xlu1 %v1432_v26, %s1487_s2 }
 0xf40   :  { %v1434_v28 = vpop.eup %1433 }
 0xf41   :  { %v742_v14 = vadd.f32 1.0, %v1434_v28 }
 0xf43   :  { %1435 = vrcp.f32 %v742_v14 }
 0xf4d   :  { %v1436_v29 = vpop.eup %1435 }
 0xf4e   :  { %v749_v32 = vmul.f32 %v1436_v29, %v747_v18 }
 0xfb1   :  { %v752_v30 = vpop.permute.xlu1 %751 }
 0xfb2   :  { %v754_v31 = vmul.f32 %v1436_v29, %v752_v30 }
 0xfb4   :  { %756 = vrot.lane.b32.xlu0 %v754_v31, %s1487_s2 }
0x1026   :  { %v757_v33 = vpop.permute.xlu0 %756 }
0x1027   :  { %v759_v34 = vadd.f32 %v757_v33, %v749_v32 }
0x1029   :  { %1437 = vtanh.f32 %v759_v34 }
0x1033   :  { %v1438_v35 = vpop.eup %1437 }
0x1034   :  { %762 = vrot.lane.b32.xlu1 %v1438_v35, %s1487_s2 }
0x10a6   :  { %v763_v36 = vpop.permute.xlu1 %762 }
0x10a7   :  { %v765_v37 = vmul.f32 %v1436_v29, %v763_v36 }
0x10a9   :  { %v767_v38 = vrot.slane %v765_v37, 5  ;;  %v989_v39 = vsel %vm988_vm7, %v987_v20, %v765_v37  ;;  %v997_v20 = vld [vmem:[%s1688_s3 + $0x18] sm:$0xff] }
0x10aa   :  { %v1378_v21 = vpack.c.bf16 %v997_v20, %v996_v17 }
0x10ab   :  { %768 = vrot.lane.b32.xlu0 %v767_v38, %s1488_s15 }
0x111d   :  { %v769_v41 = vpop.permute.xlu0 %768 }
0x111e   :  { %1278 = vmatmul.mubr.msk.f32.vlgmr.msra.gmra.mrb[4].mxu0 %vm133_vm2, %v769_v41 }
0x111f   :  { %1299 = vmatprep.mubr.msk.f32.mxu0 %vm1484_vm0, %v1485_v2  ;;  %v854_v2 = vrot.slane %v759_v34, 7 }
0x11f1   :  { %v838_v42 = vpop.f32.mrb[4].mxu0 }
0x11f2   :  { %v843_v43 = vrot.slane %v838_v42, 2  ;;  %v1279_v44 = vpop.f32.mrb[5].mxu0 }
0x11f4   :  { %v845_v45 = vadd.f32 %v843_v43, %v1581_v40 }
0x11f6   :  { %1439 = vtanh.f32 %v845_v45  ;;  %v1101_v47 = vmul.f32 -1.442695, %v845_v45 }
0x11f8   :  { %1441 = vpow2.f32 %v1101_v47 }
0x1200   :  { %v1440_v46 = vpop.eup %1439 }
0x1201   :  { %858 = vrot.lane.b32.xlu1 %v1440_v46, %s1487_s2 }
0x1202   :  { %v1442_v48 = vpop.eup %1441 }
0x1203   :  { %v849_v49 = vadd.f32 1.0, %v1442_v48 }
0x1205   :  { %1443 = vrcp.f32 %v849_v49 }
0x120f   :  { %v1444_v50 = vpop.eup %1443 }
0x1210   :  { %v856_v53 = vmul.f32 %v1444_v50, %v854_v2 }
0x1273   :  { %v859_v51 = vpop.permute.xlu1 %858 }
0x1274   :  { %v861_v52 = vmul.f32 %v1444_v50, %v859_v51 }
0x1276   :  { %863 = vrot.lane.b32.xlu0 %v861_v52, %s1487_s2 }
0x12e8   :  { %v864_v54 = vpop.permute.xlu0 %863 }
0x12e9   :  { %v866_v55 = vadd.f32 %v864_v54, %v856_v53 }
0x12eb   :  { %1445 = vtanh.f32 %v866_v55  ;;  %v961_v11 = vrot.slane %v866_v55, 7 }
0x12f5   :  { %v1446_v56 = vpop.eup %1445 }
0x12f6   :  { %869 = vrot.lane.b32.xlu1 %v1446_v56, %s1487_s2 }
0x1368   :  { %v870_v57 = vpop.permute.xlu1 %869 }
0x1369   :  { %v872_v58 = vmul.f32 %v1444_v50, %v870_v57 }
0x136b   :  { %v874_v59 = vrot.slane %v872_v58, 6  ;;  %v991_v60 = vsel %vm990_vm8, %v989_v39, %v872_v58 }
0x136d   :  { %875 = vrot.lane.b32.xlu0 %v874_v59, %s1488_s15 }
0x13df   :  { %v876_v61 = vpop.permute.xlu0 %875 }
0x13e0   :  { %1289 = vmatmul.mubr.msk.f32.vlgmr.msra.gmra.mrb[10].mxu1 %vm133_vm2, %v876_v61 }
0x14b3   :  { %v945_v62 = vpop.f32.mrb[10].mxu1 }
0x14b4   :  { %v950_v63 = vrot.slane %v945_v62, 1  ;;  %v1290_v0 = vpop.f32.mrb[11].mxu1 }
0x14b6   :  { %v952_v3 = vadd.f32 %v950_v63, %v1581_v40  ;;  %v994_v40 = vld [vmem:[%s1688_s3] sm:$0xff] }
0x14b7   :  { %v1375_v19 = vpack.c.bf16 %v995_v16, %v994_v40 }
0x14b8   :  { %1447 = vtanh.f32 %v952_v3  ;;  %v1103_v5 = vmul.f32 -1.442695, %v952_v3 }
0x14b9   :  { %1376 = vmatpush3.bf16.msra.mxu0 %v1375_v19 }
0x14ba   :  { %1449 = vpow2.f32 %v1103_v5  ;;  %1377 = vmatprep.subr.bf16.mxu0 %v1483_v1 }
0x14bd   :  { %1379 = vmatpush3.bf16.msra.mxu0 %v1378_v21 }
0x14c2   :  { %v1448_v4 = vpop.eup %1447 }
0x14c3   :  { %965 = vrot.lane.b32.xlu1 %v1448_v4, %s1487_s2 }
0x14c4   :  { %v1450_v6 = vpop.eup %1449 }
0x14c5   :  { %v956_v7 = vadd.f32 1.0, %v1450_v6 }
0x14c7   :  { %1451 = vrcp.f32 %v956_v7 }
0x14d1   :  { %v1452_v8 = vpop.eup %1451 }
0x14d2   :  { %v963_v12 = vmul.f32 %v1452_v8, %v961_v11 }
0x1535   :  { %v966_v9 = vpop.permute.xlu1 %965 }
0x1536   :  { %v968_v10 = vmul.f32 %v1452_v8, %v966_v9 }
0x1538   :  { %970 = vrot.lane.b32.xlu0 %v968_v10, %s1487_s2 }
0x15aa   :  { %v971_v13 = vpop.permute.xlu0 %970 }
0x15ab   :  { %v973_v15 = vadd.f32 %v971_v13, %v963_v12 }
0x15ad   :  { %1453 = vtanh.f32 %v973_v15 }
0x15b7   :  { %v1454_v22 = vpop.eup %1453 }
0x15b8   :  { %976 = vrot.lane.b32.xlu1 %v1454_v22, %s1487_s2 }
0x162a   :  { %v977_v23 = vpop.permute.xlu1 %976 }
0x162b   :  { %v979_v24 = vmul.f32 %v1452_v8, %v977_v23 }
0x162d   :  { %v993_v25 = vsel %vm992_vm9, %v991_v60, %v979_v24 }
0x162e   :  { %1006 = vrot.lane.b32.xlu0 %v993_v25, %s1488_s15 }
0x16a0   :  { %v1007_v26 = vpop.permute.xlu0 %1006 }
0x16a1   :  { %1300 = vmatmul.mubr.msk.f32.vlgmr.msra.gmra.mrb[6].mxu0 %vm133_vm2, %v1007_v26 }
0x1774   :  { %v1076_v28 = vpop.f32.mrb[6].mxu0 }
0x1775   :  { %v1077_v1 = vadd.f32 %v1104_v27, %v1076_v28  ;;  %v1301_v14 = vpop.f32.mrb[7].mxu0 }
0x1777   :  { %1081 = vst.msk [vmem:[%s1690_s5] sm:$0xff] %vm1080_vm10, %v1077_v1 }
0x1778   :  { %1086 = vsyncpa [#allocation3], 1 }

</bundles_post_ra>
